<compile_context>
chip_gen: v7x
topology: tpu7x:2x2x1
jax: 0.10.0
libtpu: 0.0.40
codegen_flags: <defaults>
</compile_context>

<pallas_src>
import functools

import jax
import jax.numpy as jnp
from jax import lax
from jax.experimental import pallas as pl
from jax.experimental.pallas import tpu as pltpu


def _outconv_kernel(w_ref, b_ref, x_ref, o_ref, *, chunk):
    # w_ref: SMEM (Cout, Cin) scalars; b_ref: SMEM (Cout,) scalars
    # x_ref: VMEM (bn, Cin, ts, 128); o_ref: VMEM (bn, Cout, ts, 128)
    bn, cin, ts, _ = x_ref.shape
    cout = o_ref.shape[1]
    n_chunks = ts // chunk  # wrapper guarantees chunk | ts

    # Hoist the Cout*Cin weight scalars and Cout biases out of the chunk loop
    # (JAX does not CSE broadcast_in_dim / repeated scalar reads).
    w = [[w_ref[co, ci] for ci in range(cin)] for co in range(cout)]
    bias = [b_ref[co] for co in range(cout)]

    def do_chunk(bi, r):
        # Load dense (chunk, 128) slabs for every input channel once, reuse
        # them Cout times, store dense unmasked slabs.
        xs = [x_ref[bi, ci, pl.ds(r, chunk), :] for ci in range(cin)]
        for co in range(cout):
            acc = xs[0] * w[co][0] + bias[co]
            for ci in range(1, cin):
                acc = acc + xs[ci] * w[co][ci]
            o_ref[bi, co, pl.ds(r, chunk), :] = acc.astype(o_ref.dtype)

    for bi in range(bn):  # bn is small & static
        if n_chunks <= 8:
            for c in range(n_chunks):
                do_chunk(bi, c * chunk)
        else:
            def body(c, carry):
                do_chunk(bi, pl.multiple_of(c * chunk, chunk))
                return carry

            lax.fori_loop(0, n_chunks, body, 0, unroll=8)


def out_conv(x_nchw, weight, bias, *, target_block_bytes=4 << 20):
    """1x1 conv, exact equivalent of nn.Conv2d(in_c, out_c, kernel_size=1).

    x_nchw : (N, Cin, H, W)    float32
    weight : (Cout, Cin, 1, 1) float32 (PyTorch layout)
    bias   : (Cout,)           float32
    returns: (N, Cout, H, W)   float32
    """
    N, Cin, H, W = x_nchw.shape
    Cout = weight.shape[0]
    M = H * W

    x_flat = x_nchw.reshape(N, Cin, M).astype(jnp.float32)

    # Repack spatial onto dense (sublane, lane=128) slabs.  The reshape is free
    # when M % 128 == 0 (typical U-Net H*W); otherwise pad once.
    R = pl.cdiv(M, 128)
    m_pad = R * 128
    if m_pad != M:
        # TODO(synk): for ragged M an in-kernel lane mask would avoid this copy.
        x_flat = jnp.pad(x_flat, ((0, 0), (0, 0), (0, m_pad - M)))
    x4 = x_flat.reshape(N, Cin, R, 128)

    # --- block sizing: ~target_block_bytes of (in + out) traffic per grid
    #     step so the ~0.35us/step overhead is amortized, double-buffered well
    #     under the 32 MiB scoped-VMEM default on all generations. ---
    bytes_per_row = 128 * 4 * (Cin + Cout)  # f32 in + out per sublane row
    target_rows = max(8, target_block_bytes // bytes_per_row)

    if R <= 8:
        ts = R  # full sublane extent (allowed even when not a multiple of 8)
    else:
        ts = max(8, min((target_rows // 8) * 8, (R // 8) * 8))

    bn = 1
    if ts >= R:  # whole image fits one step: fold batch to amortize overhead
        bn = int(max(1, min(N, target_rows // max(R, 1))))

    # In-kernel chunk (sublanes per inner iteration); must divide ts.
    if ts % 32 == 0:
        chunk = 32
    elif ts % 16 == 0:
        chunk = 16
    elif ts % 8 == 0:
        chunk = 8
    else:
        chunk = ts

    w_mat = weight.reshape(Cout, Cin).astype(jnp.float32)
    b_vec = bias.astype(jnp.float32)

    grid = (pl.cdiv(N, bn), pl.cdiv(R, ts))

    kernel = functools.partial(_outconv_kernel, chunk=chunk)

    y4 = pl.pallas_call(
        kernel,
        out_shape=jax.ShapeDtypeStruct((N, Cout, R, 128), jnp.float32),
        grid_spec=pltpu.PrefetchScalarGridSpec(
            num_scalar_prefetch=0,
            grid=grid,
            in_specs=[
                pl.BlockSpec(memory_space=pltpu.MemorySpace.SMEM),  # weight
                pl.BlockSpec(memory_space=pltpu.MemorySpace.SMEM),  # bias
                pl.BlockSpec((bn, Cin, ts, 128), lambda nb, rb: (nb, 0, rb, 0)),
            ],
            out_specs=pl.BlockSpec(
                (bn, Cout, ts, 128), lambda nb, rb: (nb, 0, rb, 0)
            ),
        ),
        compiler_params=pltpu.CompilerParams(
            dimension_semantics=("parallel", "parallel"),
        ),
        cost_estimate=pl.CostEstimate(
            flops=2 * N * M * Cin * Cout,
            transcendentals=0,
            bytes_accessed=4 * N * m_pad * (Cin + Cout) + 4 * Cout * (Cin + 1),
        ),
    )(w_mat, b_vec, x4)

    y_flat = y4.reshape(N, Cout, m_pad)
    if m_pad != M:
        y_flat = y_flat[:, :, :M]
    return y_flat.reshape(N, Cout, H, W)


if __name__ == "__main__":
    # Module config: OutConv(in_channels=4, out_channels=3)
    N, Cin, Cout, H, W = 2, 4, 3, 16, 16

    key = jax.random.PRNGKey(0)
    kx, kw, kb = jax.random.split(key, 3)

    x = jax.random.normal(kx, (N, Cin, H, W), dtype=jnp.float32)
    weight = jax.random.normal(kw, (Cout, Cin, 1, 1), dtype=jnp.float32) * 0.1
    bias = jax.random.normal(kb, (Cout,), dtype=jnp.float32) * 0.1

    y = out_conv(x, weight, bias)
    y = jax.block_until_ready(y)

    # Pure-JAX reference (1x1 conv == channel matmul) — silent sanity check.
    y_ref = (jnp.einsum("nchw,oc->nohw", x, weight.reshape(Cout, Cin))
             + bias[None, :, None, None])
    assert y.shape == (N, Cout, H, W)
    assert jnp.allclose(y, y_ref, atol=1e-5, rtol=1e-5)

    print("KERNEL_OK")
</pallas_src>

<mosaic_0001>
module attributes {stable_mosaic.version = 11 : i64} {
  func.func @_outconv_kernel(%arg0: i32, %arg1: i32, %arg2: memref<3x4xf32, #tpu.memory_space<smem>>, %arg3: memref<3xf32, #tpu.memory_space<smem>>, %arg4: memref<2x4x2x128xf32, #tpu.memory_space<vmem>>, %arg5: memref<2x3x2x128xf32, #tpu.memory_space<vmem>>) attributes {dimension_semantics = [#tpu.dimension_semantics<parallel>, #tpu.dimension_semantics<parallel>], iteration_bounds = array<i64: 1, 1>, scalar_prefetch = 0 : i64, scratch_operands = 0 : i64, tpu.core_type = #tpu.core_type<tc>, window_params = [{transform_indices = @transform_0, window_bounds = array<i64: 3, 4>}, {transform_indices = @transform_1, window_bounds = array<i64: 3>}, {transform_indices = @transform_2, window_bounds = array<i64: 2, 4, 2, 128>}, {transform_indices = @transform_3, window_bounds = array<i64: 2, 3, 2, 128>}]} {
    %c0 = arith.constant 0 : index
    %c0_0 = arith.constant 0 : index
    %0 = memref.load %arg2[%c0, %c0_0] : memref<3x4xf32, #tpu.memory_space<smem>>
    %c0_1 = arith.constant 0 : index
    %c1 = arith.constant 1 : index
    %1 = memref.load %arg2[%c0_1, %c1] : memref<3x4xf32, #tpu.memory_space<smem>>
    %c0_2 = arith.constant 0 : index
    %c2 = arith.constant 2 : index
    %2 = memref.load %arg2[%c0_2, %c2] : memref<3x4xf32, #tpu.memory_space<smem>>
    %c0_3 = arith.constant 0 : index
    %c3 = arith.constant 3 : index
    %3 = memref.load %arg2[%c0_3, %c3] : memref<3x4xf32, #tpu.memory_space<smem>>
    %c1_4 = arith.constant 1 : index
    %c0_5 = arith.constant 0 : index
    %4 = memref.load %arg2[%c1_4, %c0_5] : memref<3x4xf32, #tpu.memory_space<smem>>
    %c1_6 = arith.constant 1 : index
    %c1_7 = arith.constant 1 : index
    %5 = memref.load %arg2[%c1_6, %c1_7] : memref<3x4xf32, #tpu.memory_space<smem>>
    %c1_8 = arith.constant 1 : index
    %c2_9 = arith.constant 2 : index
    %6 = memref.load %arg2[%c1_8, %c2_9] : memref<3x4xf32, #tpu.memory_space<smem>>
    %c1_10 = arith.constant 1 : index
    %c3_11 = arith.constant 3 : index
    %7 = memref.load %arg2[%c1_10, %c3_11] : memref<3x4xf32, #tpu.memory_space<smem>>
    %c2_12 = arith.constant 2 : index
    %c0_13 = arith.constant 0 : index
    %8 = memref.load %arg2[%c2_12, %c0_13] : memref<3x4xf32, #tpu.memory_space<smem>>
    %c2_14 = arith.constant 2 : index
    %c1_15 = arith.constant 1 : index
    %9 = memref.load %arg2[%c2_14, %c1_15] : memref<3x4xf32, #tpu.memory_space<smem>>
    %c2_16 = arith.constant 2 : index
    %c2_17 = arith.constant 2 : index
    %10 = memref.load %arg2[%c2_16, %c2_17] : memref<3x4xf32, #tpu.memory_space<smem>>
    %c2_18 = arith.constant 2 : index
    %c3_19 = arith.constant 3 : index
    %11 = memref.load %arg2[%c2_18, %c3_19] : memref<3x4xf32, #tpu.memory_space<smem>>
    %c0_20 = arith.constant 0 : index
    %12 = memref.load %arg3[%c0_20] : memref<3xf32, #tpu.memory_space<smem>>
    %c1_21 = arith.constant 1 : index
    %13 = memref.load %arg3[%c1_21] : memref<3xf32, #tpu.memory_space<smem>>
    %c2_22 = arith.constant 2 : index
    %14 = memref.load %arg3[%c2_22] : memref<3xf32, #tpu.memory_space<smem>>
    %c0_23 = arith.constant 0 : index
    %c0_24 = arith.constant 0 : index
    %c0_25 = arith.constant 0 : index
    %c0_26 = arith.constant 0 : index
    %15 = vector.load %arg4[%c0_23, %c0_24, %c0_25, %c0_26] : memref<2x4x2x128xf32, #tpu.memory_space<vmem>>, vector<1x1x2x128xf32>
    %16 = vector.shape_cast %15 : vector<1x1x2x128xf32> to vector<2x128xf32>
    %c0_27 = arith.constant 0 : index
    %c1_28 = arith.constant 1 : index
    %c0_29 = arith.constant 0 : index
    %c0_30 = arith.constant 0 : index
    %17 = vector.load %arg4[%c0_27, %c1_28, %c0_29, %c0_30] : memref<2x4x2x128xf32, #tpu.memory_space<vmem>>, vector<1x1x2x128xf32>
    %18 = vector.shape_cast %17 : vector<1x1x2x128xf32> to vector<2x128xf32>
    %c0_31 = arith.constant 0 : index
    %c2_32 = arith.constant 2 : index
    %c0_33 = arith.constant 0 : index
    %c0_34 = arith.constant 0 : index
    %19 = vector.load %arg4[%c0_31, %c2_32, %c0_33, %c0_34] : memref<2x4x2x128xf32, #tpu.memory_space<vmem>>, vector<1x1x2x128xf32>
    %20 = vector.shape_cast %19 : vector<1x1x2x128xf32> to vector<2x128xf32>
    %c0_35 = arith.constant 0 : index
    %c3_36 = arith.constant 3 : index
    %c0_37 = arith.constant 0 : index
    %c0_38 = arith.constant 0 : index
    %21 = vector.load %arg4[%c0_35, %c3_36, %c0_37, %c0_38] : memref<2x4x2x128xf32, #tpu.memory_space<vmem>>, vector<1x1x2x128xf32>
    %22 = vector.shape_cast %21 : vector<1x1x2x128xf32> to vector<2x128xf32>
    %23 = vector.broadcast %0 : f32 to vector<2x128xf32>
    %24 = arith.mulf %16, %23 : vector<2x128xf32>
    %25 = vector.broadcast %12 : f32 to vector<2x128xf32>
    %26 = arith.addf %24, %25 : vector<2x128xf32>
    %27 = vector.broadcast %1 : f32 to vector<2x128xf32>
    %28 = arith.mulf %18, %27 : vector<2x128xf32>
    %29 = arith.addf %26, %28 : vector<2x128xf32>
    %30 = vector.broadcast %2 : f32 to vector<2x128xf32>
    %31 = arith.mulf %20, %30 : vector<2x128xf32>
    %32 = arith.addf %29, %31 : vector<2x128xf32>
    %33 = vector.broadcast %3 : f32 to vector<2x128xf32>
    %34 = arith.mulf %22, %33 : vector<2x128xf32>
    %35 = arith.addf %32, %34 : vector<2x128xf32>
    %c0_39 = arith.constant 0 : index
    %c0_40 = arith.constant 0 : index
    %c0_41 = arith.constant 0 : index
    %c0_42 = arith.constant 0 : index
    %36 = vector.load %arg5[%c0_39, %c0_40, %c0_41, %c0_42] : memref<2x3x2x128xf32, #tpu.memory_space<vmem>>, vector<1x1x2x128xf32>
    %37 = vector.shape_cast %36 : vector<1x1x2x128xf32> to vector<2x128xf32>
    %38 = vector.shape_cast %35 : vector<2x128xf32> to vector<1x1x2x128xf32>
    tpu.vector_store %arg5[%c0_39, %c0_40, %c0_41, %c0_42], %38 {strides = array<i32>} : memref<2x3x2x128xf32, #tpu.memory_space<vmem>>, vector<1x1x2x128xf32>,
    %39 = vector.broadcast %4 : f32 to vector<2x128xf32>
    %40 = arith.mulf %16, %39 : vector<2x128xf32>
    %41 = vector.broadcast %13 : f32 to vector<2x128xf32>
    %42 = arith.addf %40, %41 : vector<2x128xf32>
    %43 = vector.broadcast %5 : f32 to vector<2x128xf32>
    %44 = arith.mulf %18, %43 : vector<2x128xf32>
    %45 = arith.addf %42, %44 : vector<2x128xf32>
    %46 = vector.broadcast %6 : f32 to vector<2x128xf32>
    %47 = arith.mulf %20, %46 : vector<2x128xf32>
    %48 = arith.addf %45, %47 : vector<2x128xf32>
    %49 = vector.broadcast %7 : f32 to vector<2x128xf32>
    %50 = arith.mulf %22, %49 : vector<2x128xf32>
    %51 = arith.addf %48, %50 : vector<2x128xf32>
    %c0_43 = arith.constant 0 : index
    %c1_44 = arith.constant 1 : index
    %c0_45 = arith.constant 0 : index
    %c0_46 = arith.constant 0 : index
    %52 = vector.load %arg5[%c0_43, %c1_44, %c0_45, %c0_46] : memref<2x3x2x128xf32, #tpu.memory_space<vmem>>, vector<1x1x2x128xf32>
    %53 = vector.shape_cast %52 : vector<1x1x2x128xf32> to vector<2x128xf32>
    %54 = vector.shape_cast %51 : vector<2x128xf32> to vector<1x1x2x128xf32>
    tpu.vector_store %arg5[%c0_43, %c1_44, %c0_45, %c0_46], %54 {strides = array<i32>} : memref<2x3x2x128xf32, #tpu.memory_space<vmem>>, vector<1x1x2x128xf32>,
    %55 = vector.broadcast %8 : f32 to vector<2x128xf32>
    %56 = arith.mulf %16, %55 : vector<2x128xf32>
    %57 = vector.broadcast %14 : f32 to vector<2x128xf32>
    %58 = arith.addf %56, %57 : vector<2x128xf32>
    %59 = vector.broadcast %9 : f32 to vector<2x128xf32>
    %60 = arith.mulf %18, %59 : vector<2x128xf32>
    %61 = arith.addf %58, %60 : vector<2x128xf32>
    %62 = vector.broadcast %10 : f32 to vector<2x128xf32>
    %63 = arith.mulf %20, %62 : vector<2x128xf32>
    %64 = arith.addf %61, %63 : vector<2x128xf32>
    %65 = vector.broadcast %11 : f32 to vector<2x128xf32>
    %66 = arith.mulf %22, %65 : vector<2x128xf32>
    %67 = arith.addf %64, %66 : vector<2x128xf32>
    %c0_47 = arith.constant 0 : index
    %c2_48 = arith.constant 2 : index
    %c0_49 = arith.constant 0 : index
    %c0_50 = arith.constant 0 : index
    %68 = vector.load %arg5[%c0_47, %c2_48, %c0_49, %c0_50] : memref<2x3x2x128xf32, #tpu.memory_space<vmem>>, vector<1x1x2x128xf32>
    %69 = vector.shape_cast %68 : vector<1x1x2x128xf32> to vector<2x128xf32>
    %70 = vector.shape_cast %67 : vector<2x128xf32> to vector<1x1x2x128xf32>
    tpu.vector_store %arg5[%c0_47, %c2_48, %c0_49, %c0_50], %70 {strides = array<i32>} : memref<2x3x2x128xf32, #tpu.memory_space<vmem>>, vector<1x1x2x128xf32>,
    %c1_51 = arith.constant 1 : index
    %c0_52 = arith.constant 0 : index
    %c0_53 = arith.constant 0 : index
    %c0_54 = arith.constant 0 : index
    %71 = vector.load %arg4[%c1_51, %c0_52, %c0_53, %c0_54] : memref<2x4x2x128xf32, #tpu.memory_space<vmem>>, vector<1x1x2x128xf32>
    %72 = vector.shape_cast %71 : vector<1x1x2x128xf32> to vector<2x128xf32>
    %c1_55 = arith.constant 1 : index
    %c1_56 = arith.constant 1 : index
    %c0_57 = arith.constant 0 : index
    %c0_58 = arith.constant 0 : index
    %73 = vector.load %arg4[%c1_55, %c1_56, %c0_57, %c0_58] : memref<2x4x2x128xf32, #tpu.memory_space<vmem>>, vector<1x1x2x128xf32>
    %74 = vector.shape_cast %73 : vector<1x1x2x128xf32> to vector<2x128xf32>
    %c1_59 = arith.constant 1 : index
    %c2_60 = arith.constant 2 : index
    %c0_61 = arith.constant 0 : index
    %c0_62 = arith.constant 0 : index
    %75 = vector.load %arg4[%c1_59, %c2_60, %c0_61, %c0_62] : memref<2x4x2x128xf32, #tpu.memory_space<vmem>>, vector<1x1x2x128xf32>
    %76 = vector.shape_cast %75 : vector<1x1x2x128xf32> to vector<2x128xf32>
    %c1_63 = arith.constant 1 : index
    %c3_64 = arith.constant 3 : index
    %c0_65 = arith.constant 0 : index
    %c0_66 = arith.constant 0 : index
    %77 = vector.load %arg4[%c1_63, %c3_64, %c0_65, %c0_66] : memref<2x4x2x128xf32, #tpu.memory_space<vmem>>, vector<1x1x2x128xf32>
    %78 = vector.shape_cast %77 : vector<1x1x2x128xf32> to vector<2x128xf32>
    %79 = vector.broadcast %0 : f32 to vector<2x128xf32>
    %80 = arith.mulf %72, %79 : vector<2x128xf32>
    %81 = vector.broadcast %12 : f32 to vector<2x128xf32>
    %82 = arith.addf %80, %81 : vector<2x128xf32>
    %83 = vector.broadcast %1 : f32 to vector<2x128xf32>
    %84 = arith.mulf %74, %83 : vector<2x128xf32>
    %85 = arith.addf %82, %84 : vector<2x128xf32>
    %86 = vector.broadcast %2 : f32 to vector<2x128xf32>
    %87 = arith.mulf %76, %86 : vector<2x128xf32>
    %88 = arith.addf %85, %87 : vector<2x128xf32>
    %89 = vector.broadcast %3 : f32 to vector<2x128xf32>
    %90 = arith.mulf %78, %89 : vector<2x128xf32>
    %91 = arith.addf %88, %90 : vector<2x128xf32>
    %c1_67 = arith.constant 1 : index
    %c0_68 = arith.constant 0 : index
    %c0_69 = arith.constant 0 : index
    %c0_70 = arith.constant 0 : index
    %92 = vector.load %arg5[%c1_67, %c0_68, %c0_69, %c0_70] : memref<2x3x2x128xf32, #tpu.memory_space<vmem>>, vector<1x1x2x128xf32>
    %93 = vector.shape_cast %92 : vector<1x1x2x128xf32> to vector<2x128xf32>
    %94 = vector.shape_cast %91 : vector<2x128xf32> to vector<1x1x2x128xf32>
    tpu.vector_store %arg5[%c1_67, %c0_68, %c0_69, %c0_70], %94 {strides = array<i32>} : memref<2x3x2x128xf32, #tpu.memory_space<vmem>>, vector<1x1x2x128xf32>,
    %95 = vector.broadcast %4 : f32 to vector<2x128xf32>
    %96 = arith.mulf %72, %95 : vector<2x128xf32>
    %97 = vector.broadcast %13 : f32 to vector<2x128xf32>
    %98 = arith.addf %96, %97 : vector<2x128xf32>
    %99 = vector.broadcast %5 : f32 to vector<2x128xf32>
    %100 = arith.mulf %74, %99 : vector<2x128xf32>
    %101 = arith.addf %98, %100 : vector<2x128xf32>
    %102 = vector.broadcast %6 : f32 to vector<2x128xf32>
    %103 = arith.mulf %76, %102 : vector<2x128xf32>
    %104 = arith.addf %101, %103 : vector<2x128xf32>
    %105 = vector.broadcast %7 : f32 to vector<2x128xf32>
    %106 = arith.mulf %78, %105 : vector<2x128xf32>
    %107 = arith.addf %104, %106 : vector<2x128xf32>
    %c1_71 = arith.constant 1 : index
    %c1_72 = arith.constant 1 : index
    %c0_73 = arith.constant 0 : index
    %c0_74 = arith.constant 0 : index
    %108 = vector.load %arg5[%c1_71, %c1_72, %c0_73, %c0_74] : memref<2x3x2x128xf32, #tpu.memory_space<vmem>>, vector<1x1x2x128xf32>
    %109 = vector.shape_cast %108 : vector<1x1x2x128xf32> to vector<2x128xf32>
    %110 = vector.shape_cast %107 : vector<2x128xf32> to vector<1x1x2x128xf32>
    tpu.vector_store %arg5[%c1_71, %c1_72, %c0_73, %c0_74], %110 {strides = array<i32>} : memref<2x3x2x128xf32, #tpu.memory_space<vmem>>, vector<1x1x2x128xf32>,
    %111 = vector.broadcast %8 : f32 to vector<2x128xf32>
    %112 = arith.mulf %72, %111 : vector<2x128xf32>
    %113 = vector.broadcast %14 : f32 to vector<2x128xf32>
    %114 = arith.addf %112, %113 : vector<2x128xf32>
    %115 = vector.broadcast %9 : f32 to vector<2x128xf32>
    %116 = arith.mulf %74, %115 : vector<2x128xf32>
    %117 = arith.addf %114, %116 : vector<2x128xf32>
    %118 = vector.broadcast %10 : f32 to vector<2x128xf32>
    %119 = arith.mulf %76, %118 : vector<2x128xf32>
    %120 = arith.addf %117, %119 : vector<2x128xf32>
    %121 = vector.broadcast %11 : f32 to vector<2x128xf32>
    %122 = arith.mulf %78, %121 : vector<2x128xf32>
    %123 = arith.addf %120, %122 : vector<2x128xf32>
    %c1_75 = arith.constant 1 : index
    %c2_76 = arith.constant 2 : index
    %c0_77 = arith.constant 0 : index
    %c0_78 = arith.constant 0 : index
    %124 = vector.load %arg5[%c1_75, %c2_76, %c0_77, %c0_78] : memref<2x3x2x128xf32, #tpu.memory_space<vmem>>, vector<1x1x2x128xf32>
    %125 = vector.shape_cast %124 : vector<1x1x2x128xf32> to vector<2x128xf32>
    %126 = vector.shape_cast %123 : vector<2x128xf32> to vector<1x1x2x128xf32>
    tpu.vector_store %arg5[%c1_75, %c2_76, %c0_77, %c0_78], %126 {strides = array<i32>} : memref<2x3x2x128xf32, #tpu.memory_space<vmem>>, vector<1x1x2x128xf32>,
    return
  }
  func.func @transform_0(%arg0: i32, %arg1: i32) -> (i32, i32) {
    %c0_i32 = arith.constant 0 : i32
    %c0_i32_0 = arith.constant 0 : i32
    %c0_i32_1 = arith.constant 0 : i32
    return %c0_i32, %c0_i32_0 : i32, i32
  }
  func.func @transform_1(%arg0: i32, %arg1: i32) -> i32 {
    %c0_i32 = arith.constant 0 : i32
    %c0_i32_0 = arith.constant 0 : i32
    return %c0_i32 : i32
  }
  func.func @transform_2(%arg0: i32, %arg1: i32) -> (i32, i32, i32, i32) {
    %c0_i32 = arith.constant 0 : i32
    %c0_i32_0 = arith.constant 0 : i32
    %c0_i32_1 = arith.constant 0 : i32
    return %arg0, %c0_i32, %arg1, %c0_i32_0 : i32, i32, i32, i32
  }
  func.func @transform_3(%arg0: i32, %arg1: i32) -> (i32, i32, i32, i32) {
    %c0_i32 = arith.constant 0 : i32
    %c0_i32_0 = arith.constant 0 : i32
    %c0_i32_1 = arith.constant 0 : i32
    return %arg0, %c0_i32, %arg1, %c0_i32_0 : i32, i32, i32, i32
  }
}

</mosaic_0001>

<bundles_post_ra>
// kernel: tpu_custom_call.1
= control target key start
LH: loop header
LB: loop body
LE: loop exit
PB: predicated region body
PF: predicated region fallthrough
CT: control target
= control target key end

     0   :  { %8 = vsyncpa [#allocation5], 0  ;;  %s384_s0 = inlined_call_operand.hbm [shape: f32[3,4], index: 0, kind: input, shape index: {}]   ;;  %s385_s1 = inlined_call_operand.vmem [shape: f32[3], index: 1, kind: input, shape index: {}]   ;;  %s386_s2 = inlined_call_operand.hbm [shape: f32[2,4,2,128], index: 2, kind: input, shape index: {}]   ;;  %s387_s3 = inlined_call_operand.hbm [shape: f32[2,3,2,128], index: 3, kind: output, shape index: {}]  }
   0x1   :  { %9 = vsyncpa [#allocation6], 0 }
   0x2   :  { %10 = vsyncpa [#allocation3], 0 }
   0x3   :  { %11 = vsyncpa [#allocation4], 0  ;;  %s26_s14 = sshll.u32 %s385_s1, 4  ;;  %s194_s17 = scalar_lea.hbm %s384_s0, 64  ;;  %s27_s14 = int_to_ptr.vmem [resolvable:$true] %s26_s14 }
   0x4   :  { %p195_p0 = scmp.ne.s32.totalorder %s384_s0, %s194_s17  ;;  %p198_p1 = scmp.lt.u32.totalorder %s194_s17, %s384_s0 }
   0x6   :  { %p200_p2 = pnand %p198_p1, %p195_p0 }
   0x8   :  { %203 = shalt.err (!%p200_p2)
}
   0x9   :  { %s268_s22 = smov [#allocation2]   ;;  %s204_s1 = scalar_lea.vmem %s27_s14, 16 }
   0xa   :  { %19 = dma.hbm_to_smem %s384_s0, 64, %s268_s22, [#allocation5]  }
   0xb   :  { %p205_p3 = scmp.ne.s32.totalorder %s27_s14, %s204_s1  ;;  %p209_p4 = scmp.lt.s32.totalorder %s27_s14, %s27_s14 }
   0xc   :  { %p210_p5 = scmp.lt.s32.totalorder %s204_s1, %s204_s1 }
   0xe   :  { %p211_p6 = por %p210_p5, %p209_p4 }
  0x10   :  { %p212_p7 = pnand %p211_p6, %p205_p3 }
  0x12   :  { %215 = shalt.err (!%p212_p7)
}
  0x13   :  { %s269_s25 = smov [#allocation7]   ;;  %s270_s26 = smov [#allocation8]  }
  0x14   :  { %29 = dma.vmem_to_smem %s27_s14, 16, %s269_s25, [#allocation6]  }
  0x15   :  { %s35_s27 = sshll.u32 %s270_s26, 4  ;;  %s216_s30 = scalar_lea.hbm %s386_s2, 256  ;;  %s36_s27 = int_to_ptr.vmem [resolvable:$true] %s35_s27 }
  0x16   :  { %p217_p8 = scmp.ne.s32.totalorder %s386_s2, %s216_s30  ;;  %p220_p9 = scmp.lt.u32.totalorder %s216_s30, %s386_s2 }
  0x18   :  { %p222_p10 = pnand %p220_p9, %p217_p8 }
  0x1a   :  { %225 = shalt.err (!%p222_p10)
}
  0x1b   :  { %s226_s7 = scalar_lea.vmem %s36_s27, 256  ;;  %p231_p12 = scmp.lt.s32.totalorder %s36_s27, %s36_s27 }
  0x1c   :  { %p227_p11 = scmp.ne.s32.totalorder %s36_s27, %s226_s7  ;;  %p232_p13 = scmp.lt.s32.totalorder %s226_s7, %s226_s7 }
  0x1e   :  { %p233_p0 = por %p232_p13, %p231_p12 }
  0x20   :  { %p234_p1 = pnand %p233_p0, %p227_p11 }
  0x22   :  { %237 = shalt.err (!%p234_p1)
}
  0x23   :  { %s271_s8 = smov 32   ;;  %s272_s9 = smov 2  }
  0x24   :  { %41 = dma.hbm_to_vmem [thread:$0]  %s386_s2, 256, %s36_s27, [#allocation3], %s271_s8, %s271_s8, %s272_s9  }
  0x25   :  { %260 = dma.done.wait [#allocation5], 64  }
  0x26   :  { %261 = vsyncadd [#allocation5], 4294967232 }
  0x27   :  { %262 = dma.done.wait [#allocation6], 16  }
  0x28   :  { %263 = vsyncadd [#allocation6], 4294967280 }
  0x29   :  { %264 = dma.done.wait [#allocation3], 256  }
  0x2a   :  { %265 = vsyncadd [#allocation3], 4294967040 }
  0x2b   :  { %51 = sfence }
  0x2c   :  { %s324_s12 = sld [smem:[#allocation2]]  ;;  %s326_s13 = sld [smem:[#allocation2 + $0x1]]  ;;  %v67_v0 = vld [vmem:[#allocation8] sm:$0x3]  ;;  %v69_v1 = vld [vmem:[#allocation8 + $0x2] sm:$0x3] }
  0x2d   :  { %s328_s14 = sld [smem:[#allocation2 + $0x2]]  ;;  %s330_s15 = sld [smem:[#allocation2 + $0x3]]  ;;  %v71_v2 = vld [vmem:[#allocation8 + $0x4] sm:$0x3]  ;;  %v73_v3 = vld [vmem:[#allocation8 + $0x6] sm:$0x3] }
  0x2e   :  { %s332_s16 = sld [smem:[#allocation7]]  ;;  %s336_s17 = sld [smem:[#allocation2 + $0x81]]  ;;  %v119_v6 = vld [vmem:[#allocation8 + $0x8] sm:$0x3]  ;;  %v121_v11 = vld [vmem:[#allocation8 + $0xa] sm:$0x3] }
  0x2f   :  { %s334_s2 = sld [smem:[#allocation2 + $0x80]]  ;;  %s338_s18 = sld [smem:[#allocation2 + $0x82]]  ;;  %v123_v31 = vld [vmem:[#allocation8 + $0xc] sm:$0x3]  ;;  %v125_v36 = vld [vmem:[#allocation8 + $0xe] sm:$0x3] }
  0x30   :  { %s340_s19 = sld [smem:[#allocation2 + $0x83]]  ;;  %s342_s20 = sld [smem:[#allocation7 + $0x1]] }
  0x31   :  { %s344_s21 = sld [smem:[#allocation2 + $0x100]]  ;;  %s348_s22 = sld [smem:[#allocation2 + $0x101]] }
  0x32   :  { %v74_v4 = vstv %s324_s12  ;;  %v78_v5 = vstv %s326_s13  ;;  %s350_s23 = sld [smem:[#allocation2 + $0x102]]  ;;  %s354_s24 = sld [smem:[#allocation2 + $0x103]] }
  0x33   :  { %v75_v7 = vmul.f32 %v74_v4, %v67_v0  ;;  %v79_v8 = vmul.f32 %v78_v5, %v69_v1  ;;  %v81_v9 = vstv %s328_s14  ;;  %v84_v10 = vstv %s330_s15  ;;  %s356_s1 = sld [smem:[#allocation7 + $0x2]]  ;;  %s273_s25 = smov [#allocation9]  }
  0x34   :  { %v76_v12 = vstv %s332_s16  ;;  %v82_v13 = vmul.f32 %v81_v9, %v71_v2  ;;  %v85_v14 = vmul.f32 %v84_v10, %v73_v3  ;;  %v92_v17 = vstv %s336_s17  ;;  %s161_s26 = sshll.u32 %s273_s25, 4  ;;  %s162_s26 = int_to_ptr.vmem [resolvable:$true] %s161_s26 }
  0x35   :  { %v77_v15 = vadd.f32 %v76_v12, %v75_v7  ;;  %v88_v16 = vstv %s334_s2  ;;  %v126_v18 = vmul.f32 %v119_v6, %v74_v4  ;;  %v93_v20 = vmul.f32 %v92_v17, %v69_v1  ;;  %s238_s27 = scalar_lea.vmem %s162_s26, 192  ;;  %p243_p3 = scmp.lt.s32.totalorder %s162_s26, %s162_s26 }
  0x36   :  { %v89_v19 = vmul.f32 %v88_v16, %v67_v0  ;;  %v95_v21 = vstv %s338_s18  ;;  %v128_v22 = vmul.f32 %v121_v11, %v78_v5  ;;  %v90_v24 = vstv %s342_s20  ;;  %p239_p2 = scmp.ne.s32.totalorder %s162_s26, %s238_s27  ;;  %p244_p4 = scmp.lt.s32.totalorder %s238_s27, %s238_s27 }
  0x37   :  { %v80_v23 = vadd.f32 %v79_v8, %v77_v15  ;;  %v96_v25 = vmul.f32 %v95_v21, %v71_v2  ;;  %v98_v26 = vstv %s340_s19  ;;  %v103_v28 = vstv %s344_s21 }
  0x38   :  { %v91_v27 = vadd.f32 %v90_v24, %v89_v19  ;;  %v107_v29 = vstv %s348_s22  ;;  %v110_v30 = vstv %s350_s23  ;;  %v104_v33 = vmul.f32 %v103_v28, %v67_v0  ;;  %p245_p5 = por %p244_p4, %p243_p3 }
  0x39   :  { %v83_v32 = vadd.f32 %v82_v13, %v80_v23  ;;  %v105_v34 = vstv %s356_s1  ;;  %v108_v35 = vmul.f32 %v107_v29, %v69_v1  ;;  %v99_v38 = vmul.f32 %v98_v26, %v73_v3 }
  0x3a   :  { %v94_v37 = vadd.f32 %v93_v20, %v91_v27  ;;  %v113_v39 = vstv %s354_s24  ;;  %v127_v40 = vadd.f32 %v126_v18, %v76_v12  ;;  %v106_v42 = vadd.f32 %v105_v34, %v104_v33  ;;  %p246_p6 = pnand %p245_p5, %p239_p2 }
  0x3b   :  { %v86_v41 = vadd.f32 %v85_v14, %v83_v32  ;;  %v111_v43 = vmul.f32 %v110_v30, %v71_v2  ;;  %v130_v44 = vmul.f32 %v123_v31, %v81_v9  ;;  %v132_v47 = vmul.f32 %v125_v36, %v84_v10 }
  0x3c   :  { %v97_v45 = vadd.f32 %v96_v25, %v94_v37  ;;  %v129_v46 = vadd.f32 %v128_v22, %v127_v40  ;;  %v136_v48 = vmul.f32 %v119_v6, %v88_v16  ;;  %v109_v49 = vadd.f32 %v108_v35, %v106_v42 }
  0x3d   :  { %87 = vst [vmem:[#allocation9] sm:$0x3] %v86_v41  ;;  %v114_v50 = vmul.f32 %v113_v39, %v73_v3  ;;  %v138_v51 = vmul.f32 %v121_v11, %v92_v17  ;;  %v140_v52 = vmul.f32 %v123_v31, %v95_v21  ;;  %v146_v56 = vmul.f32 %v119_v6, %v103_v28 }
  0x3e   :  { %v100_v53 = vadd.f32 %v99_v38, %v97_v45  ;;  %v131_v54 = vadd.f32 %v130_v44, %v129_v46  ;;  %v137_v55 = vadd.f32 %v136_v48, %v90_v24  ;;  %v112_v57 = vadd.f32 %v111_v43, %v109_v49 }
  0x3f   :  { %v142_v58 = vmul.f32 %v125_v36, %v98_v26  ;;  %v148_v59 = vmul.f32 %v121_v11, %v107_v29  ;;  %v147_v62 = vadd.f32 %v146_v56, %v105_v34  ;;  %v150_v63 = vmul.f32 %v123_v31, %v110_v30 }
  0x40   :  { %102 = vst [vmem:[#allocation9 + $0x2] sm:$0x3] %v100_v53  ;;  %v133_v60 = vadd.f32 %v132_v47, %v131_v54  ;;  %v139_v61 = vadd.f32 %v138_v51, %v137_v55  ;;  %v115_v0 = vadd.f32 %v114_v50, %v112_v57  ;;  %v152_v4 = vmul.f32 %v125_v36, %v113_v39 }
  0x41   :  { %v149_v2 = vadd.f32 %v148_v59, %v147_v62 }
  0x42   :  { %135 = vst [vmem:[#allocation9 + $0x6] sm:$0x3] %v133_v60  ;;  %v141_v1 = vadd.f32 %v140_v52, %v139_v61  ;;  %117 = vst [vmem:[#allocation9 + $0x4] sm:$0x3] %v115_v0 }
  0x43   :  { %v151_v5 = vadd.f32 %v150_v63, %v149_v2 }
  0x44   :  { %v143_v3 = vadd.f32 %v142_v58, %v141_v1 }
  0x45   :  { %v153_v6 = vadd.f32 %v152_v4, %v151_v5 }
  0x46   :  { %145 = vst [vmem:[#allocation9 + $0x8] sm:$0x3] %v143_v3 }
  0x47   :  { %155 = vst [vmem:[#allocation9 + $0xa] sm:$0x3] %v153_v6 }
  0x48   :  { %249 = shalt.err (!%p246_p6)
}
  0x49   :  { %s250_s30 = scalar_lea.hbm %s387_s3, 192 }
  0x4a   :  { %p251_p7 = scmp.ne.s32.totalorder %s387_s3, %s250_s30  ;;  %p254_p8 = scmp.lt.u32.totalorder %s250_s30, %s387_s3 }
  0x4c   :  { %p256_p9 = pnand %p254_p8, %p251_p7 }
  0x4e   :  { %259 = shalt.err (!%p256_p9)
}
  0x4f   :  { %167 = dma.vmem_to_hbm [thread:$0]  %s162_s26, 192, %s387_s3, [#allocation4], %s271_s8, %s271_s8, %s272_s9  }
  0x50   :  { %266 = dma.done.wait [#allocation4], 192  }
  0x51   :  { %267 = vsyncadd [#allocation4], 4294967104 }
  0x52   :  { %171 = vsyncpa [#allocation3], 1 }
  0x53   :  { %172 = vsyncpa [#allocation4], 1 }
  0x54   :  { %173 = vsyncpa [#allocation5], 1 }
  0x55   :  { %174 = vsyncpa [#allocation6], 1 }

</bundles_post_ra>
